<compile_context>
chip_gen: v6e
topology: v6e:2x2x1
jax: 0.10.0
libtpu: 0.0.40
codegen_flags: <defaults>
</compile_context>

<pallas_src>
import functools

import jax
import jax.numpy as jnp
from jax import lax
from jax.experimental import pallas as pl
from jax.experimental.pallas import tpu as pltpu

_LANES = 128
_CHAINS = 8                 # independent accumulation chains
_SUB = 8 * _CHAINS          # accumulator rows -> (64, 128) partial block


def _round_up(x, m):
    return ((x + m - 1) // m) * m


def _ssq_kernel(o_ref, t_ref, out_ref, *, tm, nb, num_blocks, valid_rows,
                has_overflow):
    """Accumulate per-(sublane, lane) partial sums of (o - t)^2 into the
    (1, 64, 128) output block owned by this parallel index."""
    c = pl.program_id(0)            # parallel axis (per-TensorCore partial)
    i = pl.program_id(1)            # sequential reduction axis
    blk = c * nb + i                # global row-block index

    @pl.when(i == 0)
    def _init():
        out_ref[...] = jnp.zeros_like(out_ref)

    def _accum(apply_row_mask):
        d = o_ref[...].astype(jnp.float32) - t_ref[...].astype(jnp.float32)
        d2 = d * d
        if apply_row_mask:
            # Zero rows past the true row count (garbage in the partial
            # boundary block).  Squared garbage is discarded by the select.
            rid = blk * tm + lax.broadcasted_iota(jnp.int32, (tm, _LANES), 0)
            d2 = jnp.where(rid < valid_rows, d2, 0.0)
        # (tm,128) -> (tm//64, 64, 128); axis-0 sum = 8 independent vreg
        # accumulation chains, pure VPU adds (no cross-lane work in the loop).
        part = jnp.sum(d2.reshape(tm // _SUB, _SUB, _LANES), axis=0)
        out_ref[...] += part[None, :, :]

    last_blk = num_blocks - 1
    tail_rows = valid_rows - last_blk * tm
    tail_partial = tail_rows < tm               # static

    if tail_partial or has_overflow:
        @pl.when(blk < last_blk)
        def _full():
            _accum(False)

        @pl.when(blk == last_blk)
        def _tail():
            _accum(tail_partial)
        # blk > last_blk: duplicate (clamped) block owned by the other core's
        # leftover grid slot -> contributes nothing.
    else:
        _accum(False)


def l2_norm_loss(output, target, *, tile_rows=8192):
    """Pallas equivalent of L2NormLoss.forward(output, target).

    tile_rows: rows (of 128 lanes each) per grid step; must be a multiple of
               64.  Default 8192 -> 4 MiB per input tile, ~16 MiB
               double-buffered working set (fits v5e/v6e/v7x with the 32 MiB
               VMEM limit below; do not raise on v7x per review).
    """
    assert output.shape == target.shape, "output/target shape mismatch"
    assert tile_rows % _SUB == 0 and tile_rows > 0
    num_rows = target.shape[0]

    # --- wrapper-side layout plumbing (plain JAX glue) -----------------------
    o_flat = output.reshape(-1)
    t_flat = target.reshape(-1)
    total = o_flat.shape[0]

    rows = pl.cdiv(total, _LANES)               # rows of the lane-dense view

    if rows >= tile_rows:
        # Big path: pad only up to the 128-lane boundary (< 128 elements);
        # the partial tail block is handled by in-kernel masking.
        tm = tile_rows
        rows_padded = rows
    else:
        # Small path: a single block; pad to one (multiple-of-64, 128) tile.
        # Cost is negligible at this size and keeps block <= array dims.
        tm = _round_up(max(rows, 1), _SUB)
        rows_padded = tm

    padded_total = rows_padded * _LANES
    pad = padded_total - total
    if pad:
        # Zero-pad BOTH operands identically -> padded elements contribute 0.
        o_flat = jnp.pad(o_flat, (0, pad))
        t_flat = jnp.pad(t_flat, (0, pad))

    o2 = o_flat.reshape(rows_padded, _LANES)    # lane-dense [rows, 128]
    t2 = t_flat.reshape(rows_padded, _LANES)

    num_blocks = pl.cdiv(rows_padded, tm)
    num_cores = 2 if num_blocks >= 2 else 1     # v7x: one partial per TC
    nb = pl.cdiv(num_blocks, num_cores)
    has_overflow = num_cores * nb > num_blocks
    last_blk = num_blocks - 1

    if has_overflow:
        in_map = lambda c, i: (jnp.minimum(c * nb + i, last_blk), 0)
    else:
        in_map = lambda c, i: (c * nb + i, 0)
    out_map = lambda c, i: (c, 0, 0)

    kernel = functools.partial(
        _ssq_kernel, tm=tm, nb=nb, num_blocks=num_blocks,
        valid_rows=rows_padded, has_overflow=has_overflow)

    o_bytes = total * jnp.dtype(output.dtype).itemsize
    t_bytes = total * jnp.dtype(target.dtype).itemsize
    cost = pl.CostEstimate(
        flops=3 * total,
        transcendentals=0,
        bytes_accessed=o_bytes + t_bytes + num_cores * _SUB * _LANES * 4,
    )

    partials = pl.pallas_call(
        kernel,
        out_shape=jax.ShapeDtypeStruct((num_cores, _SUB, _LANES), jnp.float32),
        grid_spec=pltpu.PrefetchScalarGridSpec(
            num_scalar_prefetch=0,
            grid=(num_cores, nb),
            in_specs=[
                pl.BlockSpec((tm, _LANES), in_map),
                pl.BlockSpec((tm, _LANES), in_map),
            ],
            out_specs=pl.BlockSpec((1, _SUB, _LANES), out_map),
        ),
        compiler_params=pltpu.CompilerParams(
            dimension_semantics=("parallel", "arbitrary"),
            vmem_limit_bytes=32 * 1024 * 1024,
        ),
        cost_estimate=cost,
    )(o2, t2)

    # Tiny XLA epilogue: reduce the per-core (64,128) partials, then finalize
    # L2NormLoss: ||output - target||_2 / target.shape[0].
    return jnp.sqrt(jnp.sum(partials)) / jnp.float32(num_rows)


if __name__ == "__main__":
    key = jax.random.PRNGKey(0)
    k1, k2, k3, k4, k5, k6 = jax.random.split(key, 6)

    # Case 1: small shape consistent with the PINN loss usage (N samples, D=1),
    # default tile -> single-block small path.
    N, D = 64, 1
    output = jax.random.normal(k1, (N, D), dtype=jnp.float32)
    target = jax.random.normal(k2, (N, D), dtype=jnp.float32)
    loss = jax.block_until_ready(l2_norm_loss(output, target))
    ref = jnp.linalg.norm((output - target).ravel(), ord=2) / N
    assert jnp.allclose(loss, ref, rtol=1e-5, atol=1e-6), (loss, ref)

    # Case 2: non-128-aligned total with a small tile override -> multi-block,
    # 2-way parallel split, masked partial tail block.
    N2, D2 = 1200, 7
    output2 = jax.random.normal(k3, (N2, D2), dtype=jnp.float32)
    target2 = jax.random.normal(k4, (N2, D2), dtype=jnp.float32)
    loss2 = jax.block_until_ready(l2_norm_loss(output2, target2, tile_rows=64))
    ref2 = jnp.linalg.norm((output2 - target2).ravel(), ord=2) / N2
    assert jnp.allclose(loss2, ref2, rtol=1e-5, atol=1e-6), (loss2, ref2)

    # Case 3: 128-aligned total (fully pad-free path) with an odd block count
    # -> exercises the clamped/skipped duplicate grid slot on the parallel axis.
    N3, D3 = 24576, 1
    output3 = jax.random.normal(k5, (N3, D3), dtype=jnp.float32)
    target3 = jax.random.normal(k6, (N3, D3), dtype=jnp.float32)
    loss3 = jax.block_until_ready(l2_norm_loss(output3, target3, tile_rows=64))
    ref3 = jnp.linalg.norm((output3 - target3).ravel(), ord=2) / N3
    assert jnp.allclose(loss3, ref3, rtol=1e-4, atol=1e-6), (loss3, ref3)

    print("KERNEL_OK")
</pallas_src>

<mosaic_0001>
module attributes {stable_mosaic.version = 11 : i64} {
  func.func @_ssq_kernel(%arg0: i32, %arg1: i32, %arg2: memref<64x128xf32, #tpu.memory_space<vmem>>, %arg3: memref<64x128xf32, #tpu.memory_space<vmem>>, %arg4: memref<1x64x128xf32, #tpu.memory_space<vmem>>) attributes {dimension_semantics = [#tpu.dimension_semantics<parallel>, #tpu.dimension_semantics<arbitrary>], iteration_bounds = array<i64: 1, 1>, scalar_prefetch = 0 : i64, scratch_operands = 0 : i64, tpu.core_type = #tpu.core_type<tc>, window_params = [{transform_indices = @transform_0, window_bounds = array<i64: 64, 128>}, {transform_indices = @transform_1, window_bounds = array<i64: 64, 128>}, {transform_indices = @transform_2, window_bounds = array<i64: 1, 64, 128>}]} {
    %c0_i32 = arith.constant 0 : i32
    %0 = arith.cmpi eq, %arg1, %c0_i32 : i32
    %1 = arith.extui %0 : i1 to i32
    %c0_i32_0 = arith.constant 0 : i32
    %2 = arith.cmpi ne, %1, %c0_i32_0 : i32
    scf.if %2 {
      %cst_10 = arith.constant 0.000000e+00 : f32
      %13 = vector.broadcast %cst_10 : f32 to vector<1x64x128xf32>
      %c0_11 = arith.constant 0 : index
      %c0_12 = arith.constant 0 : index
      %c0_13 = arith.constant 0 : index
      %14 = vector.load %arg4[%c0_11, %c0_12, %c0_13] : memref<1x64x128xf32, #tpu.memory_space<vmem>>, vector<1x64x128xf32>
      tpu.vector_store %arg4[%c0_11, %c0_12, %c0_13], %13 {strides = array<i32>} : memref<1x64x128xf32, #tpu.memory_space<vmem>>, vector<1x64x128xf32>,
    } else {
    }
    %c0 = arith.constant 0 : index
    %c0_1 = arith.constant 0 : index
    %3 = vector.load %arg2[%c0, %c0_1] : memref<64x128xf32, #tpu.memory_space<vmem>>, vector<64x128xf32>
    %c0_2 = arith.constant 0 : index
    %c0_3 = arith.constant 0 : index
    %4 = vector.load %arg3[%c0_2, %c0_3] : memref<64x128xf32, #tpu.memory_space<vmem>>, vector<64x128xf32>
    %5 = arith.subf %3, %4 : vector<64x128xf32>
    %6 = arith.mulf %5, %5 : vector<64x128xf32>
    %7 = vector.shape_cast %6 : vector<64x128xf32> to vector<1x64x128xf32>
    %cst = arith.constant dense<0.000000e+00> : vector<64x128xf32>
    %8 = vector.multi_reduction <add>, %7, %cst [0] : vector<1x64x128xf32> to vector<64x128xf32>
    %c0_4 = arith.constant 0 : index
    %c0_5 = arith.constant 0 : index
    %c0_6 = arith.constant 0 : index
    %9 = vector.load %arg4[%c0_4, %c0_5, %c0_6] : memref<1x64x128xf32, #tpu.memory_space<vmem>>, vector<1x64x128xf32>
    %10 = vector.shape_cast %8 : vector<64x128xf32> to vector<1x64x128xf32>
    %11 = arith.addf %9, %10 : vector<1x64x128xf32>
    %c0_7 = arith.constant 0 : index
    %c0_8 = arith.constant 0 : index
    %c0_9 = arith.constant 0 : index
    %12 = vector.load %arg4[%c0_7, %c0_8, %c0_9] : memref<1x64x128xf32, #tpu.memory_space<vmem>>, vector<1x64x128xf32>
    tpu.vector_store %arg4[%c0_7, %c0_8, %c0_9], %11 {strides = array<i32>} : memref<1x64x128xf32, #tpu.memory_space<vmem>>, vector<1x64x128xf32>,
    return
  }
  func.func @transform_0(%arg0: i32, %arg1: i32) -> (i32, i32) {
    %c1_i32 = arith.constant 1 : i32
    %0 = arith.muli %arg0, %c1_i32 : i32
    %1 = arith.addi %0, %arg1 : i32
    %c0_i32 = arith.constant 0 : i32
    %c0_i32_0 = arith.constant 0 : i32
    return %1, %c0_i32 : i32, i32
  }
  func.func @transform_1(%arg0: i32, %arg1: i32) -> (i32, i32) {
    %c1_i32 = arith.constant 1 : i32
    %0 = arith.muli %arg0, %c1_i32 : i32
    %1 = arith.addi %0, %arg1 : i32
    %c0_i32 = arith.constant 0 : i32
    %c0_i32_0 = arith.constant 0 : i32
    return %1, %c0_i32 : i32, i32
  }
  func.func @transform_2(%arg0: i32, %arg1: i32) -> (i32, i32, i32) {
    %c0_i32 = arith.constant 0 : i32
    %c0_i32_0 = arith.constant 0 : i32
    %c0_i32_1 = arith.constant 0 : i32
    return %arg0, %c0_i32, %c0_i32_0 : i32, i32, i32
  }
}

</mosaic_0001>

<bundles_post_ra>
// kernel: tpu_custom_call.1
= control target key start
LH: loop header
LB: loop body
LE: loop exit
PB: predicated region body
PF: predicated region fallthrough
CT: control target
= control target key end

     0   :  { %7 = vsyncpa [#allocation3], 0  ;;  %s256_s0 = inlined_call_operand.hbm [shape: f32[64,128], index: 0, kind: input, shape index: {}]   ;;  %s257_s1 = inlined_call_operand.hbm [shape: f32[64,128], index: 1, kind: input, shape index: {}]   ;;  %s258_s2 = inlined_call_operand.hbm [shape: f32[1,64,128], index: 2, kind: output, shape index: {}]  }
   0x1   :  { %8 = vsyncpa [#allocation6], 0 }
   0x2   :  { %9 = vsyncpa [#allocation4], 0  ;;  %s218_s9 = smov [#allocation2]  }
   0x3   :  { %s19_s10 = sshll.u32 %s218_s9, 4  ;;  %s20_s10 = int_to_ptr.vmem [resolvable:$true] %s19_s10 }
   0x4   :  { %s160_s11 = scalar_lea.vmem %s20_s10, 1024  ;;  %p165_p1 = scmp.lt.s32.totalorder %s20_s10, %s20_s10 }
   0x5   :  { %p161_p0 = scmp.ne.s32.totalorder %s20_s10, %s160_s11  ;;  %p166_p2 = scmp.lt.s32.totalorder %s160_s11, %s160_s11 }
   0x7   :  { %p167_p3 = por %p166_p2, %p165_p1 }
   0x9   :  { %p168_p4 = pnand %p167_p3, %p161_p0 }
   0xb   :  { %171 = shalt.err (!%p168_p4)
}
   0xc   :  { %s219_s12 = smov 128   ;;  %s220_s13 = smov 8  }
   0xd   :  { %25 = dma.hbm_to_vmem [thread:$0]  %s256_s0, 1024, %s20_s10, [#allocation3], %s219_s12, %s219_s12, %s220_s13  }
   0xe   :  { %s221_s16 = smov [#allocation5]  }
   0xf   :  { %s35_s17 = sshll.u32 %s221_s16, 4  ;;  %s36_s17 = int_to_ptr.vmem [resolvable:$true] %s35_s17 }
  0x10   :  { %s180_s18 = scalar_lea.vmem %s36_s17, 1024  ;;  %p185_p6 = scmp.lt.s32.totalorder %s36_s17, %s36_s17 }
  0x11   :  { %p181_p5 = scmp.ne.s32.totalorder %s36_s17, %s180_s18  ;;  %p186_p7 = scmp.lt.s32.totalorder %s180_s18, %s180_s18 }
  0x13   :  { %p187_p8 = por %p186_p7, %p185_p6 }
  0x15   :  { %p188_p9 = pnand %p187_p8, %p181_p5 }
  0x17   :  { %191 = shalt.err (!%p188_p9)
}
  0x18   :  { %41 = dma.hbm_to_vmem [thread:$0]  %s257_s1, 1024, %s36_s17, [#allocation6], %s219_s12, %s219_s12, %s220_s13  }
  0x19   :  { %212 = dma.done.wait [#allocation3], 1024  }
  0x1a   :  { %213 = vsyncadd [#allocation3], 4294966272 }
  0x1b   :  { %214 = dma.done.wait [#allocation6], 1024  }
  0x1c   :  { %215 = vsyncadd [#allocation6], 4294966272  ;;  %v64_v0 = vld [vmem:[#allocation2] sm:$0xff]  ;;  %v65_v2 = vld [vmem:[#allocation2 + $0x8] sm:$0xff]  ;;  %s222_s0 = smov [#allocation7]  }
  0x1d   :  { %v72_v1 = vld [vmem:[#allocation5] sm:$0xff]  ;;  %v73_v4 = vld [vmem:[#allocation5 + $0x8] sm:$0xff]  ;;  %v66_v5 = vld [vmem:[#allocation2 + $0x10] sm:$0xff]  ;;  %s133_s1 = sshll.u32 %s222_s0, 4  ;;  %s134_s1 = int_to_ptr.vmem [resolvable:$true] %s133_s1 }
  0x1e   :  { %v80_v3 = vsub.f32 %v64_v0, %v72_v1  ;;  %v74_v6 = vld [vmem:[#allocation5 + $0x10] sm:$0xff]  ;;  %v81_v7 = vsub.f32 %v65_v2, %v73_v4  ;;  %v67_v9 = vld [vmem:[#allocation2 + $0x18] sm:$0xff]  ;;  %v68_v11 = vld [vmem:[#allocation2 + $0x20] sm:$0xff]  ;;  %s192_s21 = scalar_lea.vmem %s134_s1, 1024  ;;  %p197_p11 = scmp.lt.s32.totalorder %s134_s1, %s134_s1 }
  0x1f   :  { %v82_v8 = vsub.f32 %v66_v5, %v74_v6  ;;  %v75_v10 = vld [vmem:[#allocation5 + $0x18] sm:$0xff]  ;;  %v76_v14 = vld [vmem:[#allocation5 + $0x20] sm:$0xff]  ;;  %v69_v15 = vld [vmem:[#allocation2 + $0x28] sm:$0xff]  ;;  %p193_p10 = scmp.ne.s32.totalorder %s134_s1, %s192_s21  ;;  %p198_p12 = scmp.lt.s32.totalorder %s192_s21, %s192_s21 }
  0x20   :  { %v88_v12 = vmul.f32 %v80_v3, %v80_v3  ;;  %v83_v13 = vsub.f32 %v67_v9, %v75_v10  ;;  %v77_v16 = vld [vmem:[#allocation5 + $0x28] sm:$0xff]  ;;  %v89_v17 = vmul.f32 %v81_v7, %v81_v7  ;;  %v84_v19 = vsub.f32 %v68_v11, %v76_v14  ;;  %v70_v21 = vld [vmem:[#allocation2 + $0x30] sm:$0xff]  ;;  %v71_v23 = vld [vmem:[#allocation2 + $0x38] sm:$0xff] }
  0x21   :  { %v90_v18 = vmul.f32 %v82_v8, %v82_v8  ;;  %v85_v20 = vsub.f32 %v69_v15, %v77_v16  ;;  %v78_v22 = vld [vmem:[#allocation5 + $0x30] sm:$0xff]  ;;  %v79_v26 = vld [vmem:[#allocation5 + $0x38] sm:$0xff]  ;;  %p199_p13 = por %p198_p12, %p197_p11 }
  0x22   :  { %v91_v24 = vmul.f32 %v83_v13, %v83_v13  ;;  %v86_v25 = vsub.f32 %v70_v21, %v78_v22  ;;  %v92_v27 = vmul.f32 %v84_v19, %v84_v19  ;;  %120 = vst [vmem:[#allocation7] sm:$0xff] %v88_v12  ;;  %v87_v30 = vsub.f32 %v71_v23, %v79_v26 }
  0x23   :  { %v93_v28 = vmul.f32 %v85_v20, %v85_v20  ;;  %121 = vst [vmem:[#allocation7 + $0x8] sm:$0xff] %v89_v17  ;;  %122 = vst [vmem:[#allocation7 + $0x10] sm:$0xff] %v90_v18  ;;  %p200_p0 = pnand %p199_p13, %p193_p10 }
  0x24   :  { %v94_v29 = vmul.f32 %v86_v25, %v86_v25  ;;  %123 = vst [vmem:[#allocation7 + $0x18] sm:$0xff] %v91_v24  ;;  %v95_v31 = vmul.f32 %v87_v30, %v87_v30  ;;  %124 = vst [vmem:[#allocation7 + $0x20] sm:$0xff] %v92_v27 }
  0x25   :  { %125 = vst [vmem:[#allocation7 + $0x28] sm:$0xff] %v93_v28 }
  0x26   :  { %126 = vst [vmem:[#allocation7 + $0x30] sm:$0xff] %v94_v29  ;;  %127 = vst [vmem:[#allocation7 + $0x38] sm:$0xff] %v95_v31 }
  0x27   :  { %203 = shalt.err (!%p200_p0)
}
  0x28   :  { %139 = dma.vmem_to_hbm [thread:$0]  %s134_s1, 1024, %s258_s2, [#allocation4], %s219_s12, %s219_s12, %s220_s13  }
  0x29   :  { %216 = dma.done.wait [#allocation4], 1024  }
  0x2a   :  { %217 = vsyncadd [#allocation4], 4294966272 }
  0x2b   :  { %143 = vsyncpa [#allocation3], 1 }
  0x2c   :  { %144 = vsyncpa [#allocation6], 1 }
  0x2d   :  { %145 = vsyncpa [#allocation4], 1 }

</bundles_post_ra>
